<compile_context>
chip_gen: v7x
topology: tpu7x:2x2x1
jax: 0.10.0
libtpu: 0.0.40
codegen_flags: <defaults>
</compile_context>

<pallas_src>
import jax
import jax.numpy as jnp
from jax.experimental import pallas as pl
from jax.experimental.pallas import tpu as pltpu

D_IN, D_HID, D_OUT = 2048, 225, 15
D_HID_PAD = 256   # hidden width lane-aligned to 256 (zero-padded cols/rows)
D_OUT_PAD = 128   # lane-dense output slab; sliced to 15 in the wrapper


def _round_up(n, m):
    return (n + m - 1) // m * m


def _pick_tiling(x_itemsize):
    """Return (max_tile_b, vmem_limit_bytes) for the local TPU generation."""
    try:
        kind = jax.devices()[0].device_kind.lower()
    except Exception:
        kind = ""
    if "v5" in kind:
        # v5e: ~MXU-bound once x is bf16; bigger tiles buy little.
        return 512, 64 << 20
    if "v6" in kind:
        # v6e: 128 MiB VMEM -> big tiles amortize the ~0.35us/step overhead.
        return (2048 if x_itemsize <= 2 else 1024), 64 << 20
    # v7x (and unknown): 64 MiB VMEM per TensorCore -> leave headroom.
    return 1024, 48 << 20


def _mlp_kernel(x_ref, w1_ref, b1_ref, w2_ref, b2_ref, o_ref):
    # Linear(2048 -> 256[=225 padded]) on the MXU, f32 accumulation.
    x_bf = x_ref[...].astype(jnp.bfloat16)     # no-op when x is streamed as bf16
    h = jnp.dot(x_bf, w1_ref[...], preferred_element_type=jnp.float32)
    h = jnp.maximum(h + b1_ref[...], 0.0)      # bias + ReLU in f32 (VPU)
    # Linear(256 -> 128[=15 padded]); padded rows/cols of w2 are zero.
    y = jnp.dot(h.astype(jnp.bfloat16), w2_ref[...],
                preferred_element_type=jnp.float32)
    o_ref[...] = (y + b2_ref[...]).astype(o_ref.dtype)


def prepare_params(w1, b1, w2, b2):
    """One-time weight prep: lane-align + bf16-cast weights, f32 biases.

    w1 [2048,225], b1 [225] or [1,225], w2 [225,15], b2 [15] or [1,15].
    Padded b1 columns are zero (ReLU(0)=0) and padded w2 rows are zero, so
    the padded hidden lanes contribute nothing.
    """
    b1 = jnp.asarray(b1, jnp.float32).reshape(1, D_HID)
    b2 = jnp.asarray(b2, jnp.float32).reshape(1, D_OUT)
    w1_p = jnp.pad(jnp.asarray(w1, jnp.bfloat16),
                   ((0, 0), (0, D_HID_PAD - D_HID)))
    b1_p = jnp.pad(b1, ((0, 0), (0, D_HID_PAD - D_HID)))
    w2_p = jnp.pad(jnp.asarray(w2, jnp.bfloat16),
                   ((0, D_HID_PAD - D_HID), (0, D_OUT_PAD - D_OUT)))
    b2_p = jnp.pad(b2, ((0, 0), (0, D_OUT_PAD - D_OUT)))
    return w1_p, b1_p, w2_p, b2_p


def output_layer_forward(x, params, out_dtype=jnp.float32):
    """x: [B, 2048] (bf16 preferred for bandwidth; f32 accepted).
    params: output of prepare_params().  Returns [B, 3, 5] in out_dtype —
    matches OutputLayer.forward semantics (bf16 MXU inputs, f32 accumulation).
    """
    w1_p, b1_p, w2_p, b2_p = params
    B = x.shape[0]
    x_itemsize = jnp.dtype(x.dtype).itemsize

    max_tile, vmem_limit = _pick_tiling(x_itemsize)
    # 16-row granularity covers bf16 (16,128) and f32 (8,128) sublane tiling.
    tile_b = min(max_tile, _round_up(max(B, 1), 16))
    grid = (pl.cdiv(B, tile_b),)   # ragged last block handled by Pallas

    flops = 2 * B * (D_IN * D_HID_PAD + D_HID_PAD * D_OUT_PAD)
    bytes_accessed = (B * D_IN * x_itemsize                   # x stream (dominant)
                      + D_IN * D_HID_PAD * 2                  # w1 (bf16, resident)
                      + D_HID_PAD * D_OUT_PAD * 2             # w2
                      + (D_HID_PAD + D_OUT_PAD) * 4           # biases
                      + B * D_OUT_PAD * jnp.dtype(out_dtype).itemsize)

    out_pad = pl.pallas_call(
        _mlp_kernel,
        out_shape=jax.ShapeDtypeStruct((B, D_OUT_PAD), out_dtype),
        grid=grid,
        in_specs=[
            pl.BlockSpec((tile_b, D_IN), lambda i: (i, 0)),          # x (pipelined)
            pl.BlockSpec((D_IN, D_HID_PAD), lambda i: (0, 0)),       # w1 (resident)
            pl.BlockSpec((1, D_HID_PAD), lambda i: (0, 0)),          # b1 (resident)
            pl.BlockSpec((D_HID_PAD, D_OUT_PAD), lambda i: (0, 0)),  # w2 (resident)
            pl.BlockSpec((1, D_OUT_PAD), lambda i: (0, 0)),          # b2 (resident)
        ],
        out_specs=pl.BlockSpec((tile_b, D_OUT_PAD), lambda i: (i, 0)),
        compiler_params=pltpu.CompilerParams(
            dimension_semantics=("parallel",),   # shard batch over TCs on v7x
            vmem_limit_bytes=vmem_limit),
        cost_estimate=pl.CostEstimate(
            flops=flops, transcendentals=0, bytes_accessed=bytes_accessed),
    )(x, w1_p, b1_p, w2_p, b2_p)

    # Drop padded lanes and apply the free view(-1, 3, 5).
    return out_pad[:, :D_OUT].reshape(-1, 3, 5)


def init_params(key):
    """Deterministic init mimicking PyTorch nn.Linear U(-1/sqrt(fan_in), +)."""
    k1, k2, k3, k4 = jax.random.split(key, 4)
    bound1 = 1.0 / (D_IN ** 0.5)
    bound2 = 1.0 / (D_HID ** 0.5)
    w1 = jax.random.uniform(k1, (D_IN, D_HID), jnp.float32, -bound1, bound1)
    b1 = jax.random.uniform(k2, (D_HID,), jnp.float32, -bound1, bound1)
    w2 = jax.random.uniform(k3, (D_HID, D_OUT), jnp.float32, -bound2, bound2)
    b2 = jax.random.uniform(k4, (D_OUT,), jnp.float32, -bound2, bound2)
    return w1, b1, w2, b2


if __name__ == "__main__":
    key = jax.random.PRNGKey(0)
    kx, kx2, kp = jax.random.split(key, 3)

    w1, b1, w2, b2 = init_params(kp)
    params = prepare_params(w1, b1, w2, b2)     # one-time weight prep (hoisted)

    def ref_fn(x32):
        return (jnp.maximum(x32 @ w1 + b1, 0.0) @ w2 + b2).reshape(-1, 3, 5)

    # Case 1: small batch, bf16 x stream (preferred fast path).
    B = 2
    x32 = jax.random.normal(kx, (B, D_IN), jnp.float32)
    x_bf = x32.astype(jnp.bfloat16)
    y = jax.block_until_ready(output_layer_forward(x_bf, params))
    ref = ref_fn(x_bf.astype(jnp.float32))
    assert y.shape == (B, 3, 5), y.shape
    assert jnp.allclose(y, ref, atol=3e-2, rtol=3e-2), "mismatch (bf16 x)"

    # Case 2: ragged batch (B not a multiple of the tile), f32 x accepted.
    B2 = 37
    x2 = jax.random.normal(kx2, (B2, D_IN), jnp.float32)
    y2 = jax.block_until_ready(output_layer_forward(x2, params))
    ref2 = ref_fn(x2)
    assert y2.shape == (B2, 3, 5), y2.shape
    assert jnp.allclose(y2, ref2, atol=3e-2, rtol=3e-2), "mismatch (f32 x, ragged B)"

    print("KERNEL_OK")
</pallas_src>

<mosaic_0001>
module attributes {stable_mosaic.version = 11 : i64} {
  func.func @_mlp_kernel(%arg0: i32, %arg1: memref<16x2048xbf16, #tpu.memory_space<vmem>>, %arg2: memref<2048x256xbf16, #tpu.memory_space<vmem>>, %arg3: memref<1x256xf32, #tpu.memory_space<vmem>>, %arg4: memref<256x128xbf16, #tpu.memory_space<vmem>>, %arg5: memref<1x128xf32, #tpu.memory_space<vmem>>, %arg6: memref<16x128xf32, #tpu.memory_space<vmem>>) attributes {dimension_semantics = [#tpu.dimension_semantics<parallel>], iteration_bounds = array<i64: 1>, scalar_prefetch = 0 : i64, scratch_operands = 0 : i64, tpu.core_type = #tpu.core_type<tc>, window_params = [{transform_indices = @transform_0, window_bounds = array<i64: 16, 2048>}, {pipeline_mode = #tpu.pipeline_mode<synchronous>, transform_indices = @transform_1, window_bounds = array<i64: 2048, 256>}, {pipeline_mode = #tpu.pipeline_mode<synchronous>, transform_indices = @transform_2, window_bounds = array<i64: 1, 256>}, {pipeline_mode = #tpu.pipeline_mode<synchronous>, transform_indices = @transform_3, window_bounds = array<i64: 256, 128>}, {pipeline_mode = #tpu.pipeline_mode<synchronous>, transform_indices = @transform_4, window_bounds = array<i64: 1, 128>}, {transform_indices = @transform_5, window_bounds = array<i64: 16, 128>}]} {
    %c0 = arith.constant 0 : index
    %c0_0 = arith.constant 0 : index
    %0 = vector.load %arg1[%c0, %c0_0] : memref<16x2048xbf16, #tpu.memory_space<vmem>>, vector<16x2048xbf16>
    %c0_1 = arith.constant 0 : index
    %c0_2 = arith.constant 0 : index
    %1 = vector.load %arg2[%c0_1, %c0_2] : memref<2048x256xbf16, #tpu.memory_space<vmem>>, vector<2048x256xbf16>
    %cst = arith.constant dense<0.000000e+00> : vector<16x256xf32>
    %2 = tpu.matmul %0, %1, %cst {dimension_numbers = #tpu.dot_dimension_numbers<[1], [0], [0], [1], [0, 0, 1, 1], [], []>} : vector<16x2048xbf16>, vector<2048x256xbf16>, vector<16x256xf32> -> vector<16x256xf32>
    %c0_3 = arith.constant 0 : index
    %c0_4 = arith.constant 0 : index
    %3 = vector.load %arg3[%c0_3, %c0_4] : memref<1x256xf32, #tpu.memory_space<vmem>>, vector<1x256xf32>
    %4 = vector.broadcast %3 : vector<1x256xf32> to vector<16x256xf32>
    %5 = arith.addf %2, %4 : vector<16x256xf32>
    %cst_5 = arith.constant 0.000000e+00 : f32
    %6 = vector.broadcast %cst_5 : f32 to vector<16x256xf32>
    %7 = arith.maximumf %5, %6 : vector<16x256xf32>
    %8 = arith.truncf %7 : vector<16x256xf32> to vector<16x256xbf16>
    %c0_6 = arith.constant 0 : index
    %c0_7 = arith.constant 0 : index
    %9 = vector.load %arg4[%c0_6, %c0_7] : memref<256x128xbf16, #tpu.memory_space<vmem>>, vector<256x128xbf16>
    %cst_8 = arith.constant dense<0.000000e+00> : vector<16x128xf32>
    %10 = tpu.matmul %8, %9, %cst_8 {dimension_numbers = #tpu.dot_dimension_numbers<[1], [0], [0], [1], [0, 0, 1, 1], [], []>} : vector<16x256xbf16>, vector<256x128xbf16>, vector<16x128xf32> -> vector<16x128xf32>
    %c0_9 = arith.constant 0 : index
    %c0_10 = arith.constant 0 : index
    %11 = vector.load %arg5[%c0_9, %c0_10] : memref<1x128xf32, #tpu.memory_space<vmem>>, vector<1x128xf32>
    %12 = vector.broadcast %11 : vector<1x128xf32> to vector<16x128xf32>
    %13 = arith.addf %10, %12 : vector<16x128xf32>
    %c0_11 = arith.constant 0 : index
    %c0_12 = arith.constant 0 : index
    %14 = vector.load %arg6[%c0_11, %c0_12] : memref<16x128xf32, #tpu.memory_space<vmem>>, vector<16x128xf32>
    tpu.vector_store %arg6[%c0_11, %c0_12], %13 {strides = array<i32>} : memref<16x128xf32, #tpu.memory_space<vmem>>, vector<16x128xf32>,
    return
  }
  func.func @transform_0(%arg0: i32) -> (i32, i32) {
    %c0_i32 = arith.constant 0 : i32
    %c0_i32_0 = arith.constant 0 : i32
    return %arg0, %c0_i32 : i32, i32
  }
  func.func @transform_1(%arg0: i32) -> (i32, i32) {
    %c0_i32 = arith.constant 0 : i32
    %c0_i32_0 = arith.constant 0 : i32
    %c0_i32_1 = arith.constant 0 : i32
    return %c0_i32, %c0_i32_0 : i32, i32
  }
  func.func @transform_2(%arg0: i32) -> (i32, i32) {
    %c0_i32 = arith.constant 0 : i32
    %c0_i32_0 = arith.constant 0 : i32
    %c0_i32_1 = arith.constant 0 : i32
    return %c0_i32, %c0_i32_0 : i32, i32
  }
  func.func @transform_3(%arg0: i32) -> (i32, i32) {
    %c0_i32 = arith.constant 0 : i32
    %c0_i32_0 = arith.constant 0 : i32
    %c0_i32_1 = arith.constant 0 : i32
    return %c0_i32, %c0_i32_0 : i32, i32
  }
  func.func @transform_4(%arg0: i32) -> (i32, i32) {
    %c0_i32 = arith.constant 0 : i32
    %c0_i32_0 = arith.constant 0 : i32
    %c0_i32_1 = arith.constant 0 : i32
    return %c0_i32, %c0_i32_0 : i32, i32
  }
  func.func @transform_5(%arg0: i32) -> (i32, i32) {
    %c0_i32 = arith.constant 0 : i32
    %c0_i32_0 = arith.constant 0 : i32
    return %arg0, %c0_i32 : i32, i32
  }
}

</mosaic_0001>

<bundles_post_ra>
// kernel: tpu_custom_call.1
= control target key start
LH: loop header
LB: loop body
LE: loop exit
PB: predicated region body
PF: predicated region fallthrough
CT: control target
= control target key end

     0   :  { %10 = vsyncpa [#allocation3], 0  ;;  %s3541_s0 = inlined_call_operand.hbm [shape: bf16[2,2048], index: 0, kind: input, shape index: {}]   ;;  %s3542_s1 = inlined_call_operand.hbm [shape: bf16[2048,256], index: 1, kind: input, shape index: {}]   ;;  %s3543_s2 = inlined_call_operand.vmem [shape: f32[1,256], index: 2, kind: input, shape index: {}]   ;;  %s3544_s3 = inlined_call_operand.hbm [shape: bf16[256,128], index: 3, kind: input, shape index: {}]   ;;  %s3545_s4 = inlined_call_operand.vmem [shape: f32[1,128], index: 4, kind: input, shape index: {}]   ;;  %s3546_s5 = inlined_call_operand.hbm [shape: f32[2,128], index: 5, kind: output, shape index: {}]  }
   0x1   :  { %11 = vsyncpa [#allocation6], 0 }
   0x2   :  { %12 = vsyncpa [#allocation4], 0 }
   0x3   :  { %17 = vsyncadd [#allocation3], 1792  ;;  %s3335_s18 = smov [#allocation5]   ;;  %s3241_s22 = scalar_lea.hbm %s3542_s1, 32768 }
   0x4   :  { %s30_s19 = sshll.u32 %s3335_s18, 4  ;;  %p3242_p0 = scmp.ne.s32.totalorder %s3542_s1, %s3241_s22  ;;  %s31_s19 = int_to_ptr.vmem [resolvable:$true] %s30_s19 }
   0x5   :  { %p3245_p1 = scmp.lt.u32.totalorder %s3241_s22, %s3542_s1 }
   0x7   :  { %p3247_p2 = pnand %p3245_p1, %p3242_p0 }
   0x9   :  { %3250 = shalt.err (!%p3247_p2)
}
   0xa   :  { %s3251_s27 = scalar_lea.vmem %s31_s19, 32768  ;;  %p3256_p4 = scmp.lt.s32.totalorder %s31_s19, %s31_s19 }
   0xb   :  { %p3252_p3 = scmp.ne.s32.totalorder %s31_s19, %s3251_s27  ;;  %p3257_p5 = scmp.lt.s32.totalorder %s3251_s27, %s3251_s27 }
   0xd   :  { %p3258_p6 = por %p3257_p5, %p3256_p4 }
   0xf   :  { %p3259_p7 = pnand %p3258_p6, %p3252_p3 }
  0x11   :  { %3262 = shalt.err (!%p3259_p7)
}
  0x12   :  { %s3336_s28 = smov 128   ;;  %s3337_s29 = smov 8  }
  0x13   :  { %36 = dma.hbm_to_vmem [thread:$0]  %s3542_s1, 32768, %s31_s19, [#allocation6], %s3336_s28, %s3336_s28, %s3337_s29  }
  0x14   :  { %s3338_s7 = smov [#allocation2]   ;;  %s3263_s11 = scalar_lea.hbm %s3541_s0, 256 }
  0x15   :  { %s18_s8 = sshll.u32 %s3338_s7, 4  ;;  %p3264_p8 = scmp.ne.s32.totalorder %s3541_s0, %s3263_s11  ;;  %s19_s8 = int_to_ptr.vmem [resolvable:$true] %s18_s8 }
  0x16   :  { %p3267_p9 = scmp.lt.u32.totalorder %s3263_s11, %s3541_s0 }
  0x18   :  { %p3269_p10 = pnand %p3267_p9, %p3264_p8 }
  0x1a   :  { %3272 = shalt.err (!%p3269_p10)
}
  0x1b   :  { %s3273_s16 = scalar_lea.vmem %s19_s8, 256  ;;  %s3277_s1 = scalar_lea.vmem %s19_s8, 2048 }
  0x1c   :  { %p3274_p11 = scmp.ne.s32.totalorder %s19_s8, %s3273_s16  ;;  %p3278_p12 = scmp.lt.s32.totalorder %s19_s8, %s19_s8 }
  0x1d   :  { %p3279_p13 = scmp.lt.s32.totalorder %s3277_s1, %s3273_s16 }
  0x1f   :  { %p3280_p0 = por %p3279_p13, %p3278_p12 }
  0x21   :  { %p3281_p1 = pnand %p3280_p0, %p3274_p11 }
  0x23   :  { %3284 = shalt.err (!%p3281_p1)
}
  0x24   :  { %s3339_s17 = smov 256   ;;  %s3340_s18 = smov 16  }
  0x25   :  { %24 = dma.hbm_to_vmem [thread:$0]  %s3541_s0, 256, %s19_s8, [#allocation3], %s3339_s17, %s3339_s17, %s3340_s18  }
  0x26   :  { %s3341_s21 = smov [#allocation7]   ;;  %s3285_s25 = scalar_lea.hbm %s3544_s3, 2048 }
  0x27   :  { %s44_s22 = sshll.u32 %s3341_s21, 4  ;;  %p3286_p2 = scmp.ne.s32.totalorder %s3544_s3, %s3285_s25  ;;  %s45_s22 = int_to_ptr.vmem [resolvable:$true] %s44_s22 }
  0x28   :  { %p3289_p3 = scmp.lt.u32.totalorder %s3285_s25, %s3544_s3 }
  0x2a   :  { %p3291_p4 = pnand %p3289_p3, %p3286_p2 }
  0x2c   :  { %3294 = shalt.err (!%p3291_p4)
}
  0x2d   :  { %s3295_s30 = scalar_lea.vmem %s45_s22, 2048  ;;  %p3300_p6 = scmp.lt.s32.totalorder %s45_s22, %s45_s22 }
  0x2e   :  { %p3296_p5 = scmp.ne.s32.totalorder %s45_s22, %s3295_s30  ;;  %p3301_p7 = scmp.lt.s32.totalorder %s3295_s30, %s3295_s30 }
  0x30   :  { %p3302_p8 = por %p3301_p7, %p3300_p6 }
  0x32   :  { %p3303_p9 = pnand %p3302_p8, %p3296_p5 }
  0x34   :  { %3306 = shalt.err (!%p3303_p9)
}
  0x35   :  { %s3342_s0 = smov 64   ;;  %s3343_s6 = smov 4  }
  0x36   :  { %50 = dma.hbm_to_vmem [thread:$0]  %s3544_s3, 2048, %s45_s22, [#allocation6], %s3342_s0, %s3342_s0, %s3343_s6  }
  0x37   :  { %3329 = dma.done.wait [#allocation3], 2048  }
  0x38   :  { %3330 = vsyncadd [#allocation3], 4294965248 }
  0x39   :  { %3331 = dma.done.wait [#allocation6], 34816  }
  0x3a   :  { %3332 = vsyncadd [#allocation6], 4294932480  ;;  %v2817_v0 = vld [vmem:[#allocation5 + $0x4] ss:$8 sps:$4 sm:$0xff]   ;;  %v2821_v2 = vld [vmem:[#allocation5] ss:$8 sps:$4 sm:$0xff]   ;;  %v337_v39 = vlaneseq }
  0x3b   :  { %v2819_v1 = vld [vmem:[#allocation5 + $0x404] ss:$8 sps:$4 sm:$0xff]   ;;  %1931 = vmatprep.subr.bf16.mxu1 %v2817_v0  ;;  %v2822_v3 = vld [vmem:[#allocation5 + $0x400] ss:$8 sps:$4 sm:$0xff]   ;;  %v2823_v4 = vld [vmem:[#allocation5 + $0x14] ss:$8 sps:$4 sm:$0xff]  }
  0x3c   :  { %2103 = vmatprep.subr.bf16.mxu0 %v2819_v1  ;;  %1932 = vmatpush1.bf16.msra.mxu1 %v2821_v2  ;;  %v2825_v5 = vld [vmem:[#allocation5 + $0x414] ss:$8 sps:$4 sm:$0xff]   ;;  %v2827_v6 = vld [vmem:[#allocation5 + $0x10] ss:$8 sps:$4 sm:$0xff]   ;;  %v2829_v8 = vld [vmem:[#allocation5 + $0x24] ss:$8 sps:$4 sm:$0xff]  }
  0x3d   :  { %2104 = vmatpush1.bf16.msra.mxu0 %v2822_v3  ;;  %1933 = vmatprep.subr.bf16.mxu1 %v2823_v4  ;;  %v2828_v7 = vld [vmem:[#allocation5 + $0x410] ss:$8 sps:$4 sm:$0xff]   ;;  %v2831_v9 = vld [vmem:[#allocation5 + $0x424] ss:$8 sps:$4 sm:$0xff]   ;;  %v2833_v10 = vld [vmem:[#allocation5 + $0x20] ss:$8 sps:$4 sm:$0xff]  }
  0x3e   :  { %2105 = vmatprep.subr.bf16.mxu0 %v2825_v5  ;;  %v2834_v11 = vld [vmem:[#allocation5 + $0x420] ss:$8 sps:$4 sm:$0xff]   ;;  %v2835_v12 = vld [vmem:[#allocation5 + $0x34] ss:$8 sps:$4 sm:$0xff]   ;;  %v2839_v14 = vld [vmem:[#allocation5 + $0x30] ss:$8 sps:$4 sm:$0xff]  }
  0x3f   :  { %v2837_v13 = vld [vmem:[#allocation5 + $0x434] ss:$8 sps:$4 sm:$0xff]   ;;  %v2840_v15 = vld [vmem:[#allocation5 + $0x430] ss:$8 sps:$4 sm:$0xff]   ;;  %v2841_v16 = vld [vmem:[#allocation5 + $0x44] ss:$8 sps:$4 sm:$0xff]  }
  0x40   :  { %1934 = vmatpush1.bf16.msra.mxu1 %v2827_v6  ;;  %v2843_v17 = vld [vmem:[#allocation5 + $0x444] ss:$8 sps:$4 sm:$0xff]   ;;  %v2845_v18 = vld [vmem:[#allocation5 + $0x40] ss:$8 sps:$4 sm:$0xff]   ;;  %v2847_v20 = vld [vmem:[#allocation5 + $0x54] ss:$8 sps:$4 sm:$0xff]  }
  0x41   :  { %2106 = vmatpush1.bf16.msra.mxu0 %v2828_v7  ;;  %1935 = vmatprep.subr.bf16.mxu1 %v2829_v8  ;;  %v2846_v19 = vld [vmem:[#allocation5 + $0x440] ss:$8 sps:$4 sm:$0xff]   ;;  %v2849_v21 = vld [vmem:[#allocation5 + $0x454] ss:$8 sps:$4 sm:$0xff]   ;;  %v2851_v22 = vld [vmem:[#allocation5 + $0x50] ss:$8 sps:$4 sm:$0xff]  }
  0x42   :  { %2107 = vmatprep.subr.bf16.mxu0 %v2831_v9  ;;  %v2852_v23 = vld [vmem:[#allocation5 + $0x450] ss:$8 sps:$4 sm:$0xff]   ;;  %v2853_v24 = vld [vmem:[#allocation5 + $0x64] ss:$8 sps:$4 sm:$0xff]   ;;  %v2857_v26 = vld [vmem:[#allocation5 + $0x60] ss:$8 sps:$4 sm:$0xff]  }
  0x43   :  { %v2855_v25 = vld [vmem:[#allocation5 + $0x464] ss:$8 sps:$4 sm:$0xff]   ;;  %v2858_v27 = vld [vmem:[#allocation5 + $0x460] ss:$8 sps:$4 sm:$0xff]   ;;  %v2859_v28 = vld [vmem:[#allocation5 + $0x74] ss:$8 sps:$4 sm:$0xff]  }
  0x44   :  { %1936 = vmatpush1.bf16.msra.mxu1 %v2833_v10  ;;  %v2861_v29 = vld [vmem:[#allocation5 + $0x474] ss:$8 sps:$4 sm:$0xff]   ;;  %v2863_v30 = vld [vmem:[#allocation5 + $0x70] ss:$8 sps:$4 sm:$0xff]   ;;  %v2865_v32 = vld [vmem:[#allocation5 + $0x84] ss:$8 sps:$4 sm:$0xff]  }
  0x45   :  { %2108 = vmatpush1.bf16.msra.mxu0 %v2834_v11  ;;  %1937 = vmatprep.subr.bf16.mxu1 %v2835_v12  ;;  %v2864_v31 = vld [vmem:[#allocation5 + $0x470] ss:$8 sps:$4 sm:$0xff]   ;;  %v2867_v33 = vld [vmem:[#allocation5 + $0x484] ss:$8 sps:$4 sm:$0xff]   ;;  %v2869_v34 = vld [vmem:[#allocation5 + $0x80] ss:$8 sps:$4 sm:$0xff]  }
  0x46   :  { %2109 = vmatprep.subr.bf16.mxu0 %v2837_v13  ;;  %v2870_v35 = vld [vmem:[#allocation5 + $0x480] ss:$8 sps:$4 sm:$0xff]   ;;  %v2871_v36 = vld [vmem:[#allocation5 + $0x94] ss:$8 sps:$4 sm:$0xff]   ;;  %v2875_v38 = vld [vmem:[#allocation5 + $0x90] ss:$8 sps:$4 sm:$0xff]  }
  0x47   :  { %v2873_v37 = vld [vmem:[#allocation5 + $0x494] ss:$8 sps:$4 sm:$0xff]   ;;  %v3344_v40 = vmov 1966171168   ;;  %v2876_v42 = vld [vmem:[#allocation5 + $0x490] ss:$8 sps:$4 sm:$0xff]  }
  0x48   :  { %1938 = vmatpush1.bf16.msra.mxu1 %v2839_v14  ;;  %v372_v41 = vunpack.c.l.s4 %v3344_v40  ;;  %v2877_v43 = vld [vmem:[#allocation5 + $0xa4] ss:$8 sps:$4 sm:$0xff]   ;;  %v2881_v45 = vld [vmem:[#allocation5 + $0xa0] ss:$8 sps:$4 sm:$0xff]   ;;  %v3414_v47 = vshrl.u32 %v337_v39, 7 }
  0x49   :  { %2110 = vmatpush1.bf16.msra.mxu0 %v2840_v15  ;;  %1939 = vmatprep.subr.bf16.mxu1 %v2841_v16  ;;  %v2879_v44 = vld [vmem:[#allocation5 + $0x4a4] ss:$8 sps:$4 sm:$0xff]   ;;  %v2882_v46 = vld [vmem:[#allocation5 + $0x4a0] ss:$8 sps:$4 sm:$0xff]   ;;  %v2883_v49 = vld [vmem:[#allocation5 + $0xb4] ss:$8 sps:$4 sm:$0xff]  }
  0x4a   :  { %2111 = vmatprep.subr.bf16.mxu0 %v2843_v17  ;;  %v373_v48 = vunpack.c.0.s8 %v372_v41  ;;  %v2885_v50 = vld [vmem:[#allocation5 + $0x4b4] ss:$8 sps:$4 sm:$0xff]   ;;  %v2887_v51 = vld [vmem:[#allocation5 + $0xb0] ss:$8 sps:$4 sm:$0xff]   ;;  %v2889_v53 = vld [vmem:[#allocation5 + $0xc4] ss:$8 sps:$4 sm:$0xff]  }
  0x4b   :  { %v2888_v52 = vld [vmem:[#allocation5 + $0x4b0] ss:$8 sps:$4 sm:$0xff]   ;;  %v2891_v55 = vld [vmem:[#allocation5 + $0x4c4] ss:$8 sps:$4 sm:$0xff]   ;;  %v2893_v59 = vld [vmem:[#allocation5 + $0xc0] ss:$8 sps:$4 sm:$0xff]  }
  0x4c   :  { %1940 = vmatpush1.bf16.msra.mxu1 %v2845_v18  ;;  %v3417_v54 = vsub.s32 %v373_v48, %v3414_v47  ;;  %v2913_v56 = vld [vmem:[#allocation2] ss:$16 sps:$4 sm:$0xff]   ;;  %v2895_v63 = vld [vmem:[#allocation5 + $0xd4] ss:$8 sps:$4 sm:$0xff]   ;;  %v2928_v11 = vld [vmem:[#allocation2 + $0x8] ss:$16 sps:$4 sm:$0xff]  }
  0x4d   :  { %2112 = vmatpush1.bf16.msra.mxu0 %v2846_v19  ;;  %1941 = vmatprep.subr.bf16.mxu1 %v2847_v20  ;;  %v2916_v57 = vld [vmem:[#allocation2 + $0x20] ss:$16 sps:$4 sm:$0xff]   ;;  %v2897_v2 = vld [vmem:[#allocation5 + $0x4d4] ss:$8 sps:$4 sm:$0xff]   ;;  %v2931_v12 = vld [vmem:[#allocation2 + $0x28] ss:$16 sps:$4 sm:$0xff]  }
  0x4e   :  { %2113 = vmatprep.subr.bf16.mxu0 %v2849_v21  ;;  %v2919_v58 = vld [vmem:[#allocation2 + $0x40] ss:$16 sps:$4 sm:$0xff]   ;;  %v377_v62 = vrot.slane %v2913_v56, %v3417_v54  ;;  %v391_v0 = vrot.slane %v2916_v57, %v3417_v54  ;;  %v2901_v13 = vld [vmem:[#allocation5 + $0xe4] ss:$8 sps:$4 sm:$0xff]   ;;  %v2934_v16 = vld [vmem:[#allocation2 + $0x48] ss:$16 sps:$4 sm:$0xff]   ;;  %v513_v18 = vrot.slane %v2928_v11, %v3417_v54  ;;  %v527_v19 = vrot.slane %v2931_v12, %v3417_v54 }
  0x4f   :  { %v2894_v60 = vld [vmem:[#allocation5 + $0x4c0] ss:$8 sps:$4 sm:$0xff]   ;;  %v405_v1 = vrot.slane %v2919_v58, %v3417_v54  ;;  %v2899_v4 = vld [vmem:[#allocation5 + $0xd0] ss:$8 sps:$4 sm:$0xff]   ;;  %v2903_v14 = vld [vmem:[#allocation5 + $0x4e4] ss:$8 sps:$4 sm:$0xff]  }
  0x50   :  { %1942 = vmatpush1.bf16.msra.mxu1 %v2851_v22  ;;  %v2922_v61 = vld [vmem:[#allocation2 + $0x60] ss:$16 sps:$4 sm:$0xff]   ;;  %v428_v5 = vcombine.high %v377_v62, %v391_v0  ;;  %v427_v7 = vcombine.low %v377_v62, %v391_v0  ;;  %v2937_v17 = vld [vmem:[#allocation2 + $0x68] ss:$16 sps:$4 sm:$0xff]   ;;  %v2927_v40 = vld [vmem:[#allocation5 + $0x104] ss:$8 sps:$4 sm:$0xff]  }
  0x51   :  { %2114 = vmatpush1.bf16.msra.mxu0 %v2852_v23  ;;  %1943 = vmatprep.subr.bf16.mxu1 %v2853_v24  ;;  %v419_v3 = vrot.slane %v2922_v61, %v3417_v54  ;;  %v2900_v9 = vld [vmem:[#allocation5 + $0x4d0] ss:$8 sps:$4 sm:$0xff]   ;;  %v2905_v20 = vld [vmem:[#allocation5 + $0xe0] ss:$8 sps:$4 sm:$0xff]   ;;  %v541_v23 = vrot.slane %v2934_v16, %v3417_v54  ;;  %v2951_v56 = vld [vmem:[#allocation5 + $0x124] ss:$8 sps:$4 sm:$0xff]  }
  0x52   :  { %2115 = vmatprep.subr.bf16.mxu0 %v2855_v25  ;;  %v3424_v10 = vrot.slane %v428_v5, %v3417_v54  ;;  %v2906_v21 = vld [vmem:[#allocation5 + $0x4e0] ss:$8 sps:$4 sm:$0xff]   ;;  %v3432_v24 = vrot.slane %v427_v7, %v3417_v54  ;;  %v2954_v57 = vld [vmem:[#allocation5 + $0x524] ss:$8 sps:$4 sm:$0xff]   ;;  %v2960_v61 = vld [vmem:[#allocation5 + $0x534] ss:$8 sps:$4 sm:$0xff]  }
  0x53   :  { %v432_v6 = vcombine.high %v405_v1, %v419_v3  ;;  %v431_v8 = vcombine.low %v405_v1, %v419_v3  ;;  %v2949_v58 = vld [vmem:[#allocation5 + $0x120] ss:$8 sps:$4 sm:$0xff]   ;;  %v2955_v62 = vld [vmem:[#allocation5 + $0x130] ss:$8 sps:$4 sm:$0xff]   ;;  %v2963_v0 = vld [vmem:[#allocation5 + $0x144] ss:$8 sps:$4 sm:$0xff]  }
  0x54   :  { %1944 = vmatpush1.bf16.msra.mxu1 %v2857_v26  ;;  %v2907_v26 = vld [vmem:[#allocation5 + $0xf4] ss:$8 sps:$4 sm:$0xff]   ;;  %v2966_v1 = vld [vmem:[#allocation5 + $0x544] ss:$8 sps:$4 sm:$0xff]   ;;  %v2964_v3 = vld [vmem:[#allocation5 + $0x540] ss:$8 sps:$4 sm:$0xff]  }
  0x55   :  { %2116 = vmatpush1.bf16.msra.mxu0 %v2858_v27  ;;  %1945 = vmatprep.subr.bf16.mxu1 %v2859_v28  ;;  %v483_v15 = vrot.slane %v432_v6, %v3417_v54  ;;  %v3435_v25 = vrot.slane %v431_v8, %v3417_v54  ;;  %v555_v27 = vrot.slane %v2937_v17, %v3417_v54  ;;  %v2972_v5 = vld [vmem:[#allocation5 + $0x554] ss:$8 sps:$4 sm:$0xff]   ;;  %v2967_v6 = vld [vmem:[#allocation5 + $0x150] ss:$8 sps:$4 sm:$0xff]   ;;  %v2975_v8 = vld [vmem:[#allocation5 + $0x164] ss:$8 sps:$4 sm:$0xff]  }
  0x56   :  { %2117 = vmatprep.subr.bf16.mxu0 %v2861_v29  ;;  %v564_v28 = vcombine.high %v513_v18, %v527_v19  ;;  %v563_v29 = vcombine.low %v513_v18, %v527_v19  ;;  %v2970_v7 = vld [vmem:[#allocation5 + $0x550] ss:$8 sps:$4 sm:$0xff]   ;;  %v2976_v11 = vld [vmem:[#allocation5 + $0x560] ss:$8 sps:$4 sm:$0xff]   ;;  %v2981_v12 = vld [vmem:[#allocation5 + $0x174] ss:$8 sps:$4 sm:$0xff]  }
  0x57   :  { %v495_v22 = vcombine.low %v3424_v10, %v483_v15  ;;  %v2987_v16 = vld [vmem:[#allocation5 + $0x184] ss:$8 sps:$4 sm:$0xff]   ;;  %v2985_v18 = vld [vmem:[#allocation5 + $0x180] ss:$8 sps:$4 sm:$0xff]  }
  0x58   :  { %1946 = vmatpush1.bf16.msra.mxu1 %v2863_v30  ;;  %v2909_v30 = vld [vmem:[#allocation5 + $0x4f4] ss:$8 sps:$4 sm:$0xff]   ;;  %v2990_v17 = vld [vmem:[#allocation5 + $0x584] ss:$8 sps:$4 sm:$0xff]   ;;  %v2988_v19 = vld [vmem:[#allocation5 + $0x580] ss:$8 sps:$4 sm:$0xff]  }
  0x59   :  { %2118 = vmatpush1.bf16.msra.mxu0 %v2864_v31  ;;  %1947 = vmatprep.subr.bf16.mxu1 %v2865_v32  ;;  %v492_v31 = vcombine.high %v3432_v24, %v3435_v25  ;;  %v568_v32 = vcombine.high %v541_v23, %v555_v27 }
  0x5a   :  { %2119 = vmatprep.subr.bf16.mxu0 %v2867_v33  ;;  %1963 = vmatprep.mubr.bf16.mxu1 %v495_v22  ;;  %v591_v33 = vrot.slane %v564_v28, %v3417_v54  ;;  %v2991_v22 = vld [vmem:[#allocation5 + $0x190] ss:$8 sps:$4 sm:$0xff]   ;;  %v2997_v28 = vld [vmem:[#allocation5 + $0x1a0] ss:$8 sps:$4 sm:$0xff]  }
  0x5c   :  { %1948 = vmatpush1.bf16.msra.mxu1 %v2869_v34  ;;  %v567_v34 = vcombine.low %v541_v23, %v555_v27  ;;  %v2994_v23 = vld [vmem:[#allocation5 + $0x590] ss:$8 sps:$4 sm:$0xff]   ;;  %v3002_v27 = vld [vmem:[#allocation5 + $0x5a4] ss:$8 sps:$4 sm:$0xff]  }
  0x5d   :  { %2120 = vmatpush1.bf16.msra.mxu0 %v2870_v35  ;;  %1949 = vmatprep.subr.bf16.mxu1 %v2871_v36  ;;  %v2911_v35 = vld [vmem:[#allocation5 + $0xf0] ss:$8 sps:$4 sm:$0xff]   ;;  %v3442_v36 = vrot.slane %v563_v29, %v3417_v54  ;;  %v3000_v29 = vld [vmem:[#allocation5 + $0x5a0] ss:$8 sps:$4 sm:$0xff]  }
  0x5e   :  { %2121 = vmatprep.subr.bf16.mxu0 %v2873_v37  ;;  %v2912_v37 = vld [vmem:[#allocation5 + $0x4f0] ss:$8 sps:$4 sm:$0xff]   ;;  %v3446_v39 = vrot.slane %v567_v34, %v3417_v54 }
  0x5f   :  { %v3006_v34 = vld [vmem:[#allocation5 + $0x5b0] ss:$8 sps:$4 sm:$0xff]  }
  0x60   :  { %1950 = vmatpush1.bf16.msra.mxu1 %v2875_v38  ;;  %v619_v38 = vrot.slane %v568_v32, %v3417_v54  ;;  %v627_v48 = vcombine.low %v3442_v36, %v3446_v39  ;;  %v3008_v32 = vld [vmem:[#allocation5 + $0x5b4] ss:$8 sps:$4 sm:$0xff]  }
  0x61   :  { %2122 = vmatpush1.bf16.msra.mxu0 %v2876_v42  ;;  %1951 = vmatprep.subr.bf16.mxu1 %v2877_v43  ;;  %v2942_v42 = vld [vmem:[#allocation5 + $0x504] ss:$8 sps:$4 sm:$0xff]   ;;  %v628_v43 = vcombine.high %v3442_v36, %v3446_v39  ;;  %v3054_v36 = vld [vmem:[#allocation5 + $0x630] ss:$8 sps:$4 sm:$0xff]  }
  0x62   :  { %2123 = vmatprep.subr.bf16.mxu0 %v2879_v44  ;;  %v631_v41 = vcombine.low %v591_v33, %v619_v38  ;;  %v2925_v44 = vld [vmem:[#allocation5 + $0x100] ss:$8 sps:$4 sm:$0xff]   ;;  %v3059_v39 = vld [vmem:[#allocation5 + $0x244] ss:$8 sps:$4 sm:$0xff]  }
  0x64   :  { %1952 = vmatpush1.bf16.msra.mxu1 %v2881_v45  ;;  %v2940_v45 = vld [vmem:[#allocation5 + $0x500] ss:$8 sps:$4 sm:$0xff]   ;;  %2135 = vmatprep.mubr.bf16.mxu0 %v631_v41  ;;  %v2921_v41 = vld [vmem:[#allocation2 + $0x44] ss:$16 sps:$4 sm:$0xff]  }
  0x65   :  { %2124 = vmatpush1.bf16.msra.mxu0 %v2882_v46  ;;  %1953 = vmatprep.subr.bf16.mxu1 %v2883_v49  ;;  %v491_v46 = vcombine.low %v3432_v24, %v3435_v25  ;;  %v2945_v49 = vld [vmem:[#allocation5 + $0x114] ss:$8 sps:$4 sm:$0xff]  }
  0x66   :  { %2125 = vmatprep.subr.bf16.mxu0 %v2885_v50  ;;  %v2948_v50 = vld [vmem:[#allocation5 + $0x514] ss:$8 sps:$4 sm:$0xff]  }
  0x67   :  { %v3053_v24 = vld [vmem:[#allocation5 + $0x234] ss:$8 sps:$4 sm:$0xff]  }
  0x68   :  { %1954 = vmatpush1.bf16.msra.mxu1 %v2887_v51  ;;  %v496_v51 = vcombine.high %v3424_v10, %v483_v15  ;;  %v2973_v10 = vld [vmem:[#allocation5 + $0x160] ss:$8 sps:$4 sm:$0xff]   ;;  %v2982_v15 = vld [vmem:[#allocation5 + $0x570] ss:$8 sps:$4 sm:$0xff]   ;;  %v3056_v25 = vld [vmem:[#allocation5 + $0x634] ss:$8 sps:$4 sm:$0xff]  }
  0x69   :  { %2126 = vmatpush1.bf16.msra.mxu0 %v2888_v52  ;;  %1955 = vmatprep.subr.bf16.mxu1 %v2889_v53  ;;  %v632_v52 = vcombine.high %v591_v33, %v619_v38  ;;  %v2943_v53 = vld [vmem:[#allocation5 + $0x110] ss:$8 sps:$4 sm:$0xff]   ;;  %v2915_v38 = vld [vmem:[#allocation2 + $0x4] ss:$16 sps:$4 sm:$0xff]  }
  0x6a   :  { %2127 = vmatprep.subr.bf16.mxu0 %v2891_v55  ;;  %v2946_v55 = vld [vmem:[#allocation5 + $0x510] ss:$8 sps:$4 sm:$0xff]  }
  0x6b   :  { %v3003_v33 = vld [vmem:[#allocation5 + $0x1b0] ss:$8 sps:$4 sm:$0xff]  }
  0x6c   :  { %1956 = vmatpush1.bf16.msra.mxu1 %v2893_v59  ;;  %v2952_v59 = vld [vmem:[#allocation5 + $0x520] ss:$8 sps:$4 sm:$0xff]  }
  0x6d   :  { %2128 = vmatpush1.bf16.msra.mxu0 %v2894_v60  ;;  %1957 = vmatprep.subr.bf16.mxu1 %v2895_v63  ;;  %v2957_v60 = vld [vmem:[#allocation5 + $0x134] ss:$8 sps:$4 sm:$0xff]   ;;  %v2958_v63 = vld [vmem:[#allocation5 + $0x530] ss:$8 sps:$4 sm:$0xff]  }
  0x6e   :  { %2129 = vmatprep.subr.bf16.mxu0 %v2897_v2  ;;  %v2961_v2 = vld [vmem:[#allocation5 + $0x140] ss:$8 sps:$4 sm:$0xff]  }
  0x70   :  { %1958 = vmatpush1.bf16.msra.mxu1 %v2899_v4  ;;  %v2969_v4 = vld [vmem:[#allocation5 + $0x154] ss:$8 sps:$4 sm:$0xff]  }
  0x71   :  { %2130 = vmatpush1.bf16.msra.mxu0 %v2900_v9  ;;  %1959 = vmatprep.subr.bf16.mxu1 %v2901_v13  ;;  %v2978_v9 = vld [vmem:[#allocation5 + $0x564] ss:$8 sps:$4 sm:$0xff]   ;;  %v2984_v13 = vld [vmem:[#allocation5 + $0x574] ss:$8 sps:$4 sm:$0xff]  }
  0x72   :  { %2131 = vmatprep.subr.bf16.mxu0 %v2903_v14  ;;  %v2979_v14 = vld [vmem:[#allocation5 + $0x170] ss:$8 sps:$4 sm:$0xff]  }
  0x74   :  { %1960 = vmatpush1.bf16.msra.mxu1 %v2905_v20  ;;  %v2993_v20 = vld [vmem:[#allocation5 + $0x194] ss:$8 sps:$4 sm:$0xff]  }
  0x75   :  { %2132 = vmatpush1.bf16.msra.mxu0 %v2906_v21  ;;  %1961 = vmatprep.subr.bf16.mxu1 %v2907_v26  ;;  %v2996_v21 = vld [vmem:[#allocation5 + $0x594] ss:$8 sps:$4 sm:$0xff]   ;;  %v2999_v26 = vld [vmem:[#allocation5 + $0x1a4] ss:$8 sps:$4 sm:$0xff]  }
  0x76   :  { %2133 = vmatprep.subr.bf16.mxu0 %v2909_v30  ;;  %v3005_v30 = vld [vmem:[#allocation5 + $0x1b4] ss:$8 sps:$4 sm:$0xff]  }
  0x78   :  { %1962 = vmatpush1.bf16.msra.mxu1 %v2911_v35  ;;  %v3011_v35 = vld [vmem:[#allocation5 + $0x1c4] ss:$8 sps:$4 sm:$0xff]  }
  0x79   :  { %2134 = vmatpush1.bf16.msra.mxu0 %v2912_v37  ;;  %1974 = vmatprep.subr.bf16.mxu1 %v2927_v40  ;;  %v3014_v37 = vld [vmem:[#allocation5 + $0x5c4] ss:$8 sps:$4 sm:$0xff]  }
  0x7a   :  { %2146 = vmatprep.subr.bf16.mxu0 %v2942_v42  ;;  %v2918_v40 = vld [vmem:[#allocation2 + $0x24] ss:$16 sps:$4 sm:$0xff]  }
  0x7b   :  { %1964 = vmatmul.mubr.bf16.vlgmr.msra.gmra.mrb[0].mxu1 %v491_v46  ;;  %v2924_v42 = vld [vmem:[#allocation2 + $0x64] ss:$16 sps:$4 sm:$0xff]   ;;  %v2930_v46 = vld [vmem:[#allocation2 + $0xc] ss:$16 sps:$4 sm:$0xff]  }
  0x7c   :  { %2136 = vmatmul.mubr.bf16.vlgmr.msra.gmra.mrb[0].mxu0 %v627_v48  ;;  %1975 = vmatpush1.bf16.msra.mxu1 %v2925_v44  ;;  %v3009_v44 = vld [vmem:[#allocation5 + $0x1c0] ss:$8 sps:$4 sm:$0xff]   ;;  %v2933_v48 = vld [vmem:[#allocation2 + $0x2c] ss:$16 sps:$4 sm:$0xff]  }
  0x7d   :  { %2147 = vmatpush1.bf16.msra.mxu0 %v2940_v45  ;;  %1976 = vmatprep.subr.bf16.mxu1 %v2945_v49  ;;  %v3012_v45 = vld [vmem:[#allocation5 + $0x5c0] ss:$8 sps:$4 sm:$0xff]   ;;  %v3017_v49 = vld [vmem:[#allocation5 + $0x1d4] ss:$8 sps:$4 sm:$0xff]  }
  0x7e   :  { %2148 = vmatprep.subr.bf16.mxu0 %v2948_v50  ;;  %2006 = vmatprep.mubr.bf16.mxu1 %v496_v51  ;;  %v3020_v50 = vld [vmem:[#allocation5 + $0x5d4] ss:$8 sps:$4 sm:$0xff]  }
  0x7f   :  { %2178 = vmatprep.mubr.bf16.mxu0 %v632_v52  ;;  %v2936_v51 = vld [vmem:[#allocation2 + $0x4c] ss:$16 sps:$4 sm:$0xff]  }
  0x80   :  { %1977 = vmatpush1.bf16.msra.mxu1 %v2943_v53  ;;  %v2939_v52 = vld [vmem:[#allocation2 + $0x6c] ss:$16 sps:$4 sm:$0xff]   ;;  %v3015_v53 = vld [vmem:[#allocation5 + $0x1d0] ss:$8 sps:$4 sm:$0xff]  }
  0x81   :  { %2149 = vmatpush1.bf16.msra.mxu0 %v2946_v55  ;;  %1978 = vmatprep.subr.bf16.mxu1 %v2951_v56  ;;  %v3018_v55 = vld [vmem:[#allocation5 + $0x5d0] ss:$8 sps:$4 sm:$0xff]   ;;  %v3023_v56 = vld [vmem:[#allocation5 + $0x1e4] ss:$8 sps:$4 sm:$0xff]  }
  0x82   :  { %2150 = vmatprep.subr.bf16.mxu0 %v2954_v57  ;;  %v384_v57 = vrot.slane %v2915_v38, %v3417_v54 }
  0x84   :  { %1979 = vmatpush1.bf16.msra.mxu1 %v2949_v58  ;;  %v3026_v58 = vld [vmem:[#allocation5 + $0x5e4] ss:$8 sps:$4 sm:$0xff]  }
  0x85   :  { %2151 = vmatpush1.bf16.msra.mxu0 %v2952_v59  ;;  %1980 = vmatprep.subr.bf16.mxu1 %v2957_v60  ;;  %v398_v59 = vrot.slane %v2918_v40, %v3417_v54  ;;  %v412_v60 = vrot.slane %v2921_v41, %v3417_v54  ;;  %v3039_v40 = vld [vmem:[#allocation5 + $0x210] ss:$8 sps:$4 sm:$0xff]  }
  0x86   :  { %2152 = vmatprep.subr.bf16.mxu0 %v2960_v61  ;;  %v426_v61 = vrot.slane %v2924_v42, %v3417_v54  ;;  %v3042_v41 = vld [vmem:[#allocation5 + $0x610] ss:$8 sps:$4 sm:$0xff]   ;;  %v3047_v42 = vld [vmem:[#allocation5 + $0x224] ss:$8 sps:$4 sm:$0xff]  }
  0x88   :  { %1981 = vmatpush1.bf16.msra.mxu1 %v2955_v62  ;;  %v520_v62 = vrot.slane %v2930_v46, %v3417_v54  ;;  %v3048_v46 = vld [vmem:[#allocation5 + $0x620] ss:$8 sps:$4 sm:$0xff]  }
  0x89   :  { %2153 = vmatpush1.bf16.msra.mxu0 %v2958_v63  ;;  %1982 = vmatprep.subr.bf16.mxu1 %v2963_v0  ;;  %v534_v63 = vrot.slane %v2933_v48, %v3417_v54  ;;  %v548_v0 = vrot.slane %v2936_v51, %v3417_v54  ;;  %v3057_v48 = vld [vmem:[#allocation5 + $0x240] ss:$8 sps:$4 sm:$0xff]   ;;  %v3068_v51 = vld [vmem:[#allocation5 + $0x654] ss:$8 sps:$4 sm:$0xff]  }
  0x8a   :  { %2154 = vmatprep.subr.bf16.mxu0 %v2966_v1  ;;  %v562_v1 = vrot.slane %v2939_v52, %v3417_v54  ;;  %v3063_v52 = vld [vmem:[#allocation5 + $0x250] ss:$8 sps:$4 sm:$0xff]  }
  0x8c   :  { %1983 = vmatpush1.bf16.msra.mxu1 %v2961_v2  ;;  %v3021_v2 = vld [vmem:[#allocation5 + $0x1e0] ss:$8 sps:$4 sm:$0xff]  }
  0x8d   :  { %2155 = vmatpush1.bf16.msra.mxu0 %v2964_v3  ;;  %1984 = vmatprep.subr.bf16.mxu1 %v2969_v4  ;;  %v3024_v3 = vld [vmem:[#allocation5 + $0x5e0] ss:$8 sps:$4 sm:$0xff]   ;;  %v3029_v4 = vld [vmem:[#allocation5 + $0x1f4] ss:$8 sps:$4 sm:$0xff]  }
  0x8e   :  { %2156 = vmatprep.subr.bf16.mxu0 %v2972_v5  ;;  %v3032_v5 = vld [vmem:[#allocation5 + $0x5f4] ss:$8 sps:$4 sm:$0xff]  }
  0x90   :  { %1985 = vmatpush1.bf16.msra.mxu1 %v2967_v6  ;;  %v430_v6 = vcombine.high %v384_v57, %v398_v59 }
  0x91   :  { %2157 = vmatpush1.bf16.msra.mxu0 %v2970_v7  ;;  %1986 = vmatprep.subr.bf16.mxu1 %v2975_v8  ;;  %v434_v7 = vcombine.high %v412_v60, %v426_v61  ;;  %v566_v8 = vcombine.high %v520_v62, %v534_v63 }
  0x92   :  { %2158 = vmatprep.subr.bf16.mxu0 %v2978_v9  ;;  %v570_v9 = vcombine.high %v548_v0, %v562_v1 }
  0x94   :  { %1987 = vmatpush1.bf16.msra.mxu1 %v2973_v10  ;;  %v429_v10 = vcombine.low %v384_v57, %v398_v59  ;;  %v3069_v57 = vld [vmem:[#allocation5 + $0x260] ss:$8 sps:$4 sm:$0xff]   ;;  %v3077_v59 = vld [vmem:[#allocation5 + $0x274] ss:$8 sps:$4 sm:$0xff]  }
  0x95   :  { %2159 = vmatpush1.bf16.msra.mxu0 %v2976_v11  ;;  %1988 = vmatprep.subr.bf16.mxu1 %v2981_v12  ;;  %v433_v11 = vcombine.low %v412_v60, %v426_v61  ;;  %v3027_v12 = vld [vmem:[#allocation5 + $0x1f0] ss:$8 sps:$4 sm:$0xff]   ;;  %v3080_v60 = vld [vmem:[#allocation5 + $0x674] ss:$8 sps:$4 sm:$0xff]  }
  0x96   :  { %2160 = vmatprep.subr.bf16.mxu0 %v2984_v13  ;;  %v3030_v13 = vld [vmem:[#allocation5 + $0x5f0] ss:$8 sps:$4 sm:$0xff]  }
  0x97   :  { %v3075_v61 = vld [vmem:[#allocation5 + $0x270] ss:$8 sps:$4 sm:$0xff]  }
  0x98   :  { %1989 = vmatpush1.bf16.msra.mxu1 %v2979_v14  ;;  %v565_v14 = vcombine.low %v520_v62, %v534_v63  ;;  %v3078_v62 = vld [vmem:[#allocation5 + $0x670] ss:$8 sps:$4 sm:$0xff]   ;;  %v3083_v63 = vld [vmem:[#allocation5 + $0x284] ss:$8 sps:$4 sm:$0xff]  }
  0x99   :  { %2161 = vmatpush1.bf16.msra.mxu0 %v2982_v15  ;;  %1990 = vmatprep.subr.bf16.mxu1 %v2987_v16  ;;  %v569_v15 = vcombine.low %v548_v0, %v562_v1  ;;  %v3035_v16 = vld [vmem:[#allocation5 + $0x204] ss:$8 sps:$4 sm:$0xff]   ;;  %v3081_v1 = vld [vmem:[#allocation5 + $0x280] ss:$8 sps:$4 sm:$0xff]  }
  0x9a   :  { %2162 = vmatprep.subr.bf16.mxu0 %v2990_v17  ;;  %v3038_v17 = vld [vmem:[#allocation5 + $0x604] ss:$8 sps:$4 sm:$0xff]  }
  0x9b   :  { %v3086_v0 = vld [vmem:[#allocation5 + $0x684] ss:$8 sps:$4 sm:$0xff]  }
  0x9c   :  { %1991 = vmatpush1.bf16.msra.mxu1 %v2985_v18  ;;  %v3464_v18 = vrot.slane %v430_v6, %v3417_v54  ;;  %v3090_v6 = vld [vmem:[#allocation5 + $0x690] ss:$8 sps:$4 sm:$0xff]  }
  0x9d   :  { %2163 = vmatpush1.bf16.msra.mxu0 %v2988_v19  ;;  %1992 = vmatprep.subr.bf16.mxu1 %v2993_v20  ;;  %v3467_v19 = vrot.slane %v434_v7, %v3417_v54  ;;  %v3470_v20 = vrot.slane %v566_v8, %v3417_v54  ;;  %v3095_v7 = vld [vmem:[#allocation5 + $0x2a4] ss:$8 sps:$4 sm:$0xff]  }
  0x9e   :  { %2164 = vmatprep.subr.bf16.mxu0 %v2996_v21  ;;  %v3473_v21 = vrot.slane %v570_v9, %v3417_v54  ;;  %v3098_v8 = vld [vmem:[#allocation5 + $0x6a4] ss:$8 sps:$4 sm:$0xff]   ;;  %v3093_v9 = vld [vmem:[#allocation5 + $0x2a0] ss:$8 sps:$4 sm:$0xff]  }
  0xa0   :  { %1993 = vmatpush1.bf16.msra.mxu1 %v2991_v22  ;;  %v3476_v22 = vrot.slane %v429_v10, %v3417_v54  ;;  %v633_v38 = vcombine.low %v3470_v20, %v3473_v21  ;;  %v3096_v10 = vld [vmem:[#allocation5 + $0x6a0] ss:$8 sps:$4 sm:$0xff]  }
  0xa1   :  { %2165 = vmatpush1.bf16.msra.mxu0 %v2994_v23  ;;  %1994 = vmatprep.subr.bf16.mxu1 %v2999_v26  ;;  %v3479_v23 = vrot.slane %v433_v11, %v3417_v54  ;;  %v3033_v26 = vld [vmem:[#allocation5 + $0x200] ss:$8 sps:$4 sm:$0xff]   ;;  %v3101_v11 = vld [vmem:[#allocation5 + $0x2b4] ss:$8 sps:$4 sm:$0xff]  }
  0xa2   :  { %2166 = vmatprep.subr.bf16.mxu0 %v3002_v27  ;;  %v3036_v27 = vld [vmem:[#allocation5 + $0x600] ss:$8 sps:$4 sm:$0xff]  }
  0xa4   :  { %1995 = vmatpush1.bf16.msra.mxu1 %v2997_v28  ;;  %v3482_v28 = vrot.slane %v565_v14, %v3417_v54  ;;  %v3102_v14 = vld [vmem:[#allocation5 + $0x6b0] ss:$8 sps:$4 sm:$0xff]  }
  0xa5   :  { %2167 = vmatpush1.bf16.msra.mxu0 %v3000_v29  ;;  %1996 = vmatprep.subr.bf16.mxu1 %v3005_v30  ;;  %v3485_v29 = vrot.slane %v569_v15, %v3417_v54  ;;  %v3041_v30 = vld [vmem:[#allocation5 + $0x214] ss:$8 sps:$4 sm:$0xff]   ;;  %v497_v54 = vcombine.low %v3464_v18, %v3467_v19  ;;  %v3107_v15 = vld [vmem:[#allocation5 + $0x2c4] ss:$8 sps:$4 sm:$0xff]  }
  0xa6   :  { %2168 = vmatprep.subr.bf16.mxu0 %v3008_v32  ;;  %v498_v32 = vcombine.high %v3464_v18, %v3467_v19  ;;  %v3155_v18 = vld [vmem:[#allocation5 + $0x344] ss:$8 sps:$4 sm:$0xff]  }
  0xa7   :  { %v3158_v19 = vld [vmem:[#allocation5 + $0x744] ss:$8 sps:$4 sm:$0xff]  }
  0xa8   :  { %1997 = vmatpush1.bf16.msra.mxu1 %v3003_v33  ;;  %v634_v33 = vcombine.high %v3470_v20, %v3473_v21  ;;  %v3153_v20 = vld [vmem:[#allocation5 + $0x340] ss:$8 sps:$4 sm:$0xff]  }
  0xa9   :  { %2169 = vmatpush1.bf16.msra.mxu0 %v3006_v34  ;;  %1998 = vmatprep.subr.bf16.mxu1 %v3011_v35  ;;  %v494_v34 = vcombine.high %v3476_v22, %v3479_v23  ;;  %v3044_v35 = vld [vmem:[#allocation5 + $0x614] ss:$8 sps:$4 sm:$0xff]   ;;  %v3156_v21 = vld [vmem:[#allocation5 + $0x740] ss:$8 sps:$4 sm:$0xff]  }
  0xaa   :  { %2170 = vmatprep.subr.bf16.mxu0 %v3014_v37  ;;  %v630_v37 = vcombine.high %v3482_v28, %v3485_v29 }
  0xac   :  { %1999 = vmatpush1.bf16.msra.mxu1 %v3009_v44  ;;  %v3050_v44 = vld [vmem:[#allocation5 + $0x624] ss:$8 sps:$4 sm:$0xff]  }
  0xad   :  { %2171 = vmatpush1.bf16.msra.mxu0 %v3012_v45  ;;  %2000 = vmatprep.subr.bf16.mxu1 %v3017_v49  ;;  %v3045_v45 = vld [vmem:[#allocation5 + $0x220] ss:$8 sps:$4 sm:$0xff]  }
  0xae   :  { %2172 = vmatprep.subr.bf16.mxu0 %v3020_v50  ;;  %v3060_v49 = vld [vmem:[#allocation5 + $0x640] ss:$8 sps:$4 sm:$0xff]   ;;  %v3065_v50 = vld [vmem:[#allocation5 + $0x254] ss:$8 sps:$4 sm:$0xff]  }
  0xb0   :  { %2001 = vmatpush1.bf16.msra.mxu1 %v3015_v53  ;;  %v3066_v53 = vld [vmem:[#allocation5 + $0x650] ss:$8 sps:$4 sm:$0xff]  }
  0xb1   :  { %2173 = vmatpush1.bf16.msra.mxu0 %v3018_v55  ;;  %2002 = vmatprep.subr.bf16.mxu1 %v3023_v56  ;;  %v3071_v55 = vld [vmem:[#allocation5 + $0x264] ss:$8 sps:$4 sm:$0xff]  }
  0xb2   :  { %2174 = vmatprep.subr.bf16.mxu0 %v3026_v58  ;;  %v3074_v56 = vld [vmem:[#allocation5 + $0x664] ss:$8 sps:$4 sm:$0xff]   ;;  %v3072_v58 = vld [vmem:[#allocation5 + $0x660] ss:$8 sps:$4 sm:$0xff]  }
  0xb4   :  { %2003 = vmatpush1.bf16.msra.mxu1 %v3021_v2  ;;  %v3084_v2 = vld [vmem:[#allocation5 + $0x680] ss:$8 sps:$4 sm:$0xff]  }
  0xb5   :  { %2175 = vmatpush1.bf16.msra.mxu0 %v3024_v3  ;;  %2004 = vmatprep.subr.bf16.mxu1 %v3029_v4  ;;  %v3089_v3 = vld [vmem:[#allocation5 + $0x294] ss:$8 sps:$4 sm:$0xff]  }
  0xb6   :  { %2176 = vmatprep.subr.bf16.mxu0 %v3032_v5  ;;  %v3092_v4 = vld [vmem:[#allocation5 + $0x694] ss:$8 sps:$4 sm:$0xff]   ;;  %v3087_v5 = vld [vmem:[#allocation5 + $0x290] ss:$8 sps:$4 sm:$0xff]  }
  0xb8   :  { %2005 = vmatpush1.bf16.msra.mxu1 %v3027_v12  ;;  %v3104_v12 = vld [vmem:[#allocation5 + $0x6b4] ss:$8 sps:$4 sm:$0xff]  }
  0xb9   :  { %2177 = vmatpush1.bf16.msra.mxu0 %v3030_v13  ;;  %2017 = vmatprep.subr.bf16.mxu1 %v3035_v16  ;;  %v3099_v13 = vld [vmem:[#allocation5 + $0x2b0] ss:$8 sps:$4 sm:$0xff]   ;;  %v3110_v16 = vld [vmem:[#allocation5 + $0x6c4] ss:$8 sps:$4 sm:$0xff]  }
  0xba   :  { %2189 = vmatprep.subr.bf16.mxu0 %v3038_v17  ;;  %v3105_v17 = vld [vmem:[#allocation5 + $0x2c0] ss:$8 sps:$4 sm:$0xff]  }
  0xbb   :  { %2007 = vmatmul.mubr.bf16.vlgmr.msra.gmra.mrb[0].mxu1 %v492_v31  ;;  %v3051_v31 = vld [vmem:[#allocation5 + $0x230] ss:$8 sps:$4 sm:$0xff]  }
  0xbc   :  { %2179 = vmatmul.mubr.bf16.vlgmr.msra.gmra.mrb[0].mxu0 %v628_v43  ;;  %2018 = vmatpush1.bf16.msra.mxu1 %v3033_v26  ;;  %v3062_v43 = vld [vmem:[#allocation5 + $0x644] ss:$8 sps:$4 sm:$0xff]   ;;  %v3108_v26 = vld [vmem:[#allocation5 + $0x6c0] ss:$8 sps:$4 sm:$0xff]  }
  0xbd   :  { %2190 = vmatpush1.bf16.msra.mxu0 %v3036_v27  ;;  %2019 = vmatprep.subr.bf16.mxu1 %v3041_v30  ;;  %v3113_v27 = vld [vmem:[#allocation5 + $0x2d4] ss:$8 sps:$4 sm:$0xff]  }
  0xbe   :  { %2191 = vmatprep.subr.bf16.mxu0 %v3044_v35  ;;  %2049 = vmatprep.mubr.bf16.mxu1 %v497_v54  ;;  %v3116_v30 = vld [vmem:[#allocation5 + $0x6d4] ss:$8 sps:$4 sm:$0xff]   ;;  %v3111_v35 = vld [vmem:[#allocation5 + $0x2d0] ss:$8 sps:$4 sm:$0xff]  }
  0xbf   :  { %2221 = vmatprep.mubr.bf16.mxu0 %v633_v38  ;;  %v3114_v54 = vld [vmem:[#allocation5 + $0x6d0] ss:$8 sps:$4 sm:$0xff]   ;;  %v3119_v38 = vld [vmem:[#allocation5 + $0x2e4] ss:$8 sps:$4 sm:$0xff]  }
  0xc0   :  { %2020 = vmatpush1.bf16.msra.mxu1 %v3039_v40  ;;  %v3122_v40 = vld [vmem:[#allocation5 + $0x6e4] ss:$8 sps:$4 sm:$0xff]  }
  0xc1   :  { %2192 = vmatpush1.bf16.msra.mxu0 %v3042_v41  ;;  %2021 = vmatprep.subr.bf16.mxu1 %v3047_v42  ;;  %v3117_v41 = vld [vmem:[#allocation5 + $0x2e0] ss:$8 sps:$4 sm:$0xff]  }
  0xc2   :  { %2193 = vmatprep.subr.bf16.mxu0 %v3050_v44  ;;  %v3120_v42 = vld [vmem:[#allocation5 + $0x6e0] ss:$8 sps:$4 sm:$0xff]   ;;  %v3125_v44 = vld [vmem:[#allocation5 + $0x2f4] ss:$8 sps:$4 sm:$0xff]  }
  0xc4   :  { %2022 = vmatpush1.bf16.msra.mxu1 %v3045_v45  ;;  %v3128_v45 = vld [vmem:[#allocation5 + $0x6f4] ss:$8 sps:$4 sm:$0xff]  }
  0xc5   :  { %2194 = vmatpush1.bf16.msra.mxu0 %v3048_v46  ;;  %2023 = vmatprep.subr.bf16.mxu1 %v3053_v24  ;;  %v3123_v46 = vld [vmem:[#allocation5 + $0x2f0] ss:$8 sps:$4 sm:$0xff]  }
  0xc6   :  { %2195 = vmatprep.subr.bf16.mxu0 %v3056_v25  ;;  %v3126_v24 = vld [vmem:[#allocation5 + $0x6f0] ss:$8 sps:$4 sm:$0xff]   ;;  %v3131_v25 = vld [vmem:[#allocation5 + $0x304] ss:$8 sps:$4 sm:$0xff]  }
  0xc8   :  { %2024 = vmatpush1.bf16.msra.mxu1 %v3051_v31  ;;  %v3134_v31 = vld [vmem:[#allocation5 + $0x704] ss:$8 sps:$4 sm:$0xff]  }
  0xc9   :  { %2196 = vmatpush1.bf16.msra.mxu0 %v3054_v36  ;;  %2025 = vmatprep.subr.bf16.mxu1 %v3059_v39  ;;  %v3129_v36 = vld [vmem:[#allocation5 + $0x300] ss:$8 sps:$4 sm:$0xff]  }
  0xca   :  { %2197 = vmatprep.subr.bf16.mxu0 %v3062_v43  ;;  %v3132_v39 = vld [vmem:[#allocation5 + $0x700] ss:$8 sps:$4 sm:$0xff]   ;;  %v493_v43 = vcombine.low %v3476_v22, %v3479_v23 }
  0xcb   :  { %v3235_v22 = vld [vmem:[#allocation7 + $0x68] sm:$0xff]  }
  0xcc   :  { %2026 = vmatpush1.bf16.msra.mxu1 %v3057_v48  ;;  %v629_v48 = vcombine.low %v3482_v28, %v3485_v29  ;;  %v3236_v23 = vld [vmem:[#allocation7 + $0x28] sm:$0xff]   ;;  %v3237_v28 = vld [vmem:[#allocation7 + $0x70] sm:$0xff]  }
  0xcd   :  { %2198 = vmatpush1.bf16.msra.mxu0 %v3060_v49  ;;  %2027 = vmatprep.subr.bf16.mxu1 %v3065_v50  ;;  %v3137_v49 = vld [vmem:[#allocation5 + $0x314] ss:$8 sps:$4 sm:$0xff]  }
  0xce   :  { %2199 = vmatprep.subr.bf16.mxu0 %v3068_v51  ;;  %v3140_v50 = vld [vmem:[#allocation5 + $0x714] ss:$8 sps:$4 sm:$0xff]   ;;  %v3135_v51 = vld [vmem:[#allocation5 + $0x310] ss:$8 sps:$4 sm:$0xff]  }
  0xcf   :  { %v3238_v29 = vld [vmem:[#allocation7 + $0x30] sm:$0xff]  }
  0xd0   :  { %2028 = vmatpush1.bf16.msra.mxu1 %v3063_v52  ;;  %v3138_v52 = vld [vmem:[#allocation5 + $0x710] ss:$8 sps:$4 sm:$0xff]  }
  0xd1   :  { %2200 = vmatpush1.bf16.msra.mxu0 %v3066_v53  ;;  %2029 = vmatprep.subr.bf16.mxu1 %v3071_v55  ;;  %v3143_v53 = vld [vmem:[#allocation5 + $0x324] ss:$8 sps:$4 sm:$0xff]  }
  0xd2   :  { %2201 = vmatprep.subr.bf16.mxu0 %v3074_v56  ;;  %v3146_v55 = vld [vmem:[#allocation5 + $0x724] ss:$8 sps:$4 sm:$0xff]   ;;  %v3141_v56 = vld [vmem:[#allocation5 + $0x320] ss:$8 sps:$4 sm:$0xff]  }
  0xd4   :  { %2030 = vmatpush1.bf16.msra.mxu1 %v3069_v57  ;;  %v3144_v57 = vld [vmem:[#allocation5 + $0x720] ss:$8 sps:$4 sm:$0xff]  }
  0xd5   :  { %2202 = vmatpush1.bf16.msra.mxu0 %v3072_v58  ;;  %2031 = vmatprep.subr.bf16.mxu1 %v3077_v59  ;;  %v3149_v58 = vld [vmem:[#allocation5 + $0x334] ss:$8 sps:$4 sm:$0xff]  }
  0xd6   :  { %2203 = vmatprep.subr.bf16.mxu0 %v3080_v60  ;;  %v3152_v59 = vld [vmem:[#allocation5 + $0x734] ss:$8 sps:$4 sm:$0xff]   ;;  %v3147_v60 = vld [vmem:[#allocation5 + $0x330] ss:$8 sps:$4 sm:$0xff]  }
  0xd8   :  { %2032 = vmatpush1.bf16.msra.mxu1 %v3075_v61  ;;  %v3150_v61 = vld [vmem:[#allocation5 + $0x730] ss:$8 sps:$4 sm:$0xff]  }
  0xd9   :  { %2204 = vmatpush1.bf16.msra.mxu0 %v3078_v62  ;;  %2033 = vmatprep.subr.bf16.mxu1 %v3083_v63  ;;  %v3159_v62 = vld [vmem:[#allocation5 + $0x350] ss:$8 sps:$4 sm:$0xff]  }
  0xda   :  { %2205 = vmatprep.subr.bf16.mxu0 %v3086_v0  ;;  %v3162_v63 = vld [vmem:[#allocation5 + $0x750] ss:$8 sps:$4 sm:$0xff]   ;;  %v3167_v0 = vld [vmem:[#allocation5 + $0x364] ss:$8 sps:$4 sm:$0xff]  }
  0xdc   :  { %2034 = vmatpush1.bf16.msra.mxu1 %v3081_v1  ;;  %v3170_v1 = vld [vmem:[#allocation5 + $0x764] ss:$8 sps:$4 sm:$0xff]  }
  0xdd   :  { %2206 = vmatpush1.bf16.msra.mxu0 %v3084_v2  ;;  %2035 = vmatprep.subr.bf16.mxu1 %v3089_v3  ;;  %v3165_v2 = vld [vmem:[#allocation5 + $0x360] ss:$8 sps:$4 sm:$0xff]  }
  0xde   :  { %2207 = vmatprep.subr.bf16.mxu0 %v3092_v4  ;;  %v3168_v3 = vld [vmem:[#allocation5 + $0x760] ss:$8 sps:$4 sm:$0xff]   ;;  %v3173_v4 = vld [vmem:[#allocation5 + $0x374] ss:$8 sps:$4 sm:$0xff]  }
  0xe0   :  { %2036 = vmatpush1.bf16.msra.mxu1 %v3087_v5  ;;  %v3176_v5 = vld [vmem:[#allocation5 + $0x774] ss:$8 sps:$4 sm:$0xff]  }
  0xe1   :  { %2208 = vmatpush1.bf16.msra.mxu0 %v3090_v6  ;;  %2037 = vmatprep.subr.bf16.mxu1 %v3095_v7  ;;  %v3171_v6 = vld [vmem:[#allocation5 + $0x370] ss:$8 sps:$4 sm:$0xff]  }
  0xe2   :  { %2209 = vmatprep.subr.bf16.mxu0 %v3098_v8  ;;  %v3174_v7 = vld [vmem:[#allocation5 + $0x770] ss:$8 sps:$4 sm:$0xff]   ;;  %v3179_v8 = vld [vmem:[#allocation5 + $0x384] ss:$8 sps:$4 sm:$0xff]  }
  0xe4   :  { %2038 = vmatpush1.bf16.msra.mxu1 %v3093_v9  ;;  %v3182_v9 = vld [vmem:[#allocation5 + $0x784] ss:$8 sps:$4 sm:$0xff]  }
  0xe5   :  { %2210 = vmatpush1.bf16.msra.mxu0 %v3096_v10  ;;  %2039 = vmatprep.subr.bf16.mxu1 %v3101_v11  ;;  %v3177_v10 = vld [vmem:[#allocation5 + $0x380] ss:$8 sps:$4 sm:$0xff]  }
  0xe6   :  { %2211 = vmatprep.subr.bf16.mxu0 %v3104_v12  ;;  %v3180_v11 = vld [vmem:[#allocation5 + $0x780] ss:$8 sps:$4 sm:$0xff]   ;;  %v3185_v12 = vld [vmem:[#allocation5 + $0x394] ss:$8 sps:$4 sm:$0xff]  }
  0xe8   :  { %2040 = vmatpush1.bf16.msra.mxu1 %v3099_v13  ;;  %v3188_v13 = vld [vmem:[#allocation5 + $0x794] ss:$8 sps:$4 sm:$0xff]  }
  0xe9   :  { %2212 = vmatpush1.bf16.msra.mxu0 %v3102_v14  ;;  %2041 = vmatprep.subr.bf16.mxu1 %v3107_v15  ;;  %v3183_v14 = vld [vmem:[#allocation5 + $0x390] ss:$8 sps:$4 sm:$0xff]  }
  0xea   :  { %2213 = vmatprep.subr.bf16.mxu0 %v3110_v16  ;;  %v3186_v15 = vld [vmem:[#allocation5 + $0x790] ss:$8 sps:$4 sm:$0xff]   ;;  %v3191_v16 = vld [vmem:[#allocation5 + $0x3a4] ss:$8 sps:$4 sm:$0xff]  }
  0xec   :  { %2042 = vmatpush1.bf16.msra.mxu1 %v3105_v17  ;;  %v3194_v17 = vld [vmem:[#allocation5 + $0x7a4] ss:$8 sps:$4 sm:$0xff]  }
  0xed   :  { %2214 = vmatpush1.bf16.msra.mxu0 %v3108_v26  ;;  %2043 = vmatprep.subr.bf16.mxu1 %v3113_v27  ;;  %v3189_v26 = vld [vmem:[#allocation5 + $0x3a0] ss:$8 sps:$4 sm:$0xff]  }
  0xee   :  { %2215 = vmatprep.subr.bf16.mxu0 %v3116_v30  ;;  %v3192_v27 = vld [vmem:[#allocation5 + $0x7a0] ss:$8 sps:$4 sm:$0xff]   ;;  %v3197_v30 = vld [vmem:[#allocation5 + $0x3b4] ss:$8 sps:$4 sm:$0xff]  }
  0xf0   :  { %2044 = vmatpush1.bf16.msra.mxu1 %v3111_v35  ;;  %v3200_v35 = vld [vmem:[#allocation5 + $0x7b4] ss:$8 sps:$4 sm:$0xff]  }
  0xf1   :  { %2216 = vmatpush1.bf16.msra.mxu0 %v3114_v54  ;;  %2045 = vmatprep.subr.bf16.mxu1 %v3119_v38  ;;  %v3195_v54 = vld [vmem:[#allocation5 + $0x3b0] ss:$8 sps:$4 sm:$0xff]  }
  0xf2   :  { %2217 = vmatprep.subr.bf16.mxu0 %v3122_v40  ;;  %v3198_v38 = vld [vmem:[#allocation5 + $0x7b0] ss:$8 sps:$4 sm:$0xff]   ;;  %v3203_v40 = vld [vmem:[#allocation5 + $0x3c4] ss:$8 sps:$4 sm:$0xff]  }
  0xf4   :  { %2046 = vmatpush1.bf16.msra.mxu1 %v3117_v41  ;;  %v3206_v41 = vld [vmem:[#allocation5 + $0x7c4] ss:$8 sps:$4 sm:$0xff]  }
  0xf5   :  { %2218 = vmatpush1.bf16.msra.mxu0 %v3120_v42  ;;  %2047 = vmatprep.subr.bf16.mxu1 %v3125_v44  ;;  %v3201_v42 = vld [vmem:[#allocation5 + $0x3c0] ss:$8 sps:$4 sm:$0xff]  }
  0xf6   :  { %2219 = vmatprep.subr.bf16.mxu0 %v3128_v45  ;;  %v3204_v44 = vld [vmem:[#allocation5 + $0x7c0] ss:$8 sps:$4 sm:$0xff]   ;;  %v3209_v45 = vld [vmem:[#allocation5 + $0x3d4] ss:$8 sps:$4 sm:$0xff]  }
  0xf8   :  { %2048 = vmatpush1.bf16.msra.mxu1 %v3123_v46  ;;  %v3212_v46 = vld [vmem:[#allocation5 + $0x7d4] ss:$8 sps:$4 sm:$0xff]  }
  0xf9   :  { %2220 = vmatpush1.bf16.msra.mxu0 %v3126_v24  ;;  %2060 = vmatprep.subr.bf16.mxu1 %v3131_v25  ;;  %v3207_v24 = vld [vmem:[#allocation5 + $0x3d0] ss:$8 sps:$4 sm:$0xff]  }
  0xfa   :  { %2232 = vmatprep.subr.bf16.mxu0 %v3134_v31  ;;  %v3210_v25 = vld [vmem:[#allocation5 + $0x7d0] ss:$8 sps:$4 sm:$0xff]   ;;  %v3215_v31 = vld [vmem:[#allocation5 + $0x3e4] ss:$8 sps:$4 sm:$0xff]  }
  0xfb   :  { %2050 = vmatmul.mubr.bf16.vlgmr.msra.gmra.mrb[0].mxu1 %v493_v43  ;;  %v3216_v43 = vld [vmem:[#allocation5 + $0x7e0] ss:$8 sps:$4 sm:$0xff]  }
  0xfc   :  { %2222 = vmatmul.mubr.bf16.vlgmr.msra.gmra.mrb[0].mxu0 %v629_v48  ;;  %2061 = vmatpush1.bf16.msra.mxu1 %v3129_v36  ;;  %v3218_v36 = vld [vmem:[#allocation5 + $0x7e4] ss:$8 sps:$4 sm:$0xff]   ;;  %v3221_v48 = vld [vmem:[#allocation5 + $0x3f4] ss:$8 sps:$4 sm:$0xff]  }
  0xfd   :  { %2233 = vmatpush1.bf16.msra.mxu0 %v3132_v39  ;;  %2062 = vmatprep.subr.bf16.mxu1 %v3137_v49  ;;  %v3213_v39 = vld [vmem:[#allocation5 + $0x3e0] ss:$8 sps:$4 sm:$0xff]   ;;  %v3224_v49 = vld [vmem:[#allocation5 + $0x7f4] ss:$8 sps:$4 sm:$0xff]  }
  0xfe   :  { %2234 = vmatprep.subr.bf16.mxu0 %v3140_v50  ;;  %2092 = vmatprep.mubr.bf16.mxu1 %v498_v32  ;;  %v3161_v32 = vld [vmem:[#allocation5 + $0x354] ss:$8 sps:$4 sm:$0xff]   ;;  %v3219_v50 = vld [vmem:[#allocation5 + $0x3f0] ss:$8 sps:$4 sm:$0xff]  }
  0xff   :  { %2264 = vmatprep.mubr.bf16.mxu0 %v634_v33  ;;  %v3164_v33 = vld [vmem:[#allocation5 + $0x754] ss:$8 sps:$4 sm:$0xff]  }
 0x100   :  { %2063 = vmatpush1.bf16.msra.mxu1 %v3135_v51  ;;  %v3222_v51 = vld [vmem:[#allocation5 + $0x7f0] ss:$8 sps:$4 sm:$0xff]  }
 0x101   :  { %2235 = vmatpush1.bf16.msra.mxu0 %v3138_v52  ;;  %2064 = vmatprep.subr.bf16.mxu1 %v3143_v53  ;;  %v3225_v52 = vld [vmem:[#allocation7 + $0x40] sm:$0xff]  }
 0x102   :  { %2236 = vmatprep.subr.bf16.mxu0 %v3146_v55  ;;  %v3226_v53 = vld [vmem:[#allocation7] sm:$0xff]   ;;  %v3227_v55 = vld [vmem:[#allocation7 + $0x48] sm:$0xff]  }
 0x104   :  { %2065 = vmatpush1.bf16.msra.mxu1 %v3141_v56  ;;  %v3228_v56 = vld [vmem:[#allocation7 + $0x8] sm:$0xff]  }
 0x105   :  { %2237 = vmatpush1.bf16.msra.mxu0 %v3144_v57  ;;  %2066 = vmatprep.subr.bf16.mxu1 %v3149_v58  ;;  %v3229_v57 = vld [vmem:[#allocation7 + $0x50] sm:$0xff]  }
 0x106   :  { %2238 = vmatprep.subr.bf16.mxu0 %v3152_v59  ;;  %v3230_v58 = vld [vmem:[#allocation7 + $0x10] sm:$0xff]   ;;  %v3231_v59 = vld [vmem:[#allocation7 + $0x58] sm:$0xff]  }
 0x108   :  { %2067 = vmatpush1.bf16.msra.mxu1 %v3147_v60  ;;  %v3232_v60 = vld [vmem:[#allocation7 + $0x18] sm:$0xff]  }
 0x109   :  { %2239 = vmatpush1.bf16.msra.mxu0 %v3150_v61  ;;  %2068 = vmatprep.subr.bf16.mxu1 %v3155_v18  ;;  %v3233_v61 = vld [vmem:[#allocation7 + $0x60] sm:$0xff]  }
 0x10a   :  { %2240 = vmatprep.subr.bf16.mxu0 %v3158_v19  ;;  %v3234_v18 = vld [vmem:[#allocation7 + $0x20] sm:$0xff]   ;;  %v339_v19 = vsub.s32 0, %v3414_v47 }
 0x10c   :  { %2069 = vmatpush1.bf16.msra.mxu1 %v3153_v20  ;;  %v335_v20 = vld [vmem:[%s3543_s2] sm:$0x3] }
 0x10d   :  { %2241 = vmatpush1.bf16.msra.mxu0 %v3156_v21  ;;  %2070 = vmatprep.subr.bf16.mxu1 %v3161_v32  ;;  %v343_v21 = vsub.s32 1, %v3414_v47  ;;  %v340_v32 = vrot.slane %v335_v20, %v339_v19 }
 0x10e   :  { %2242 = vmatprep.subr.bf16.mxu0 %v3164_v33 }
 0x10f   :  { %v344_v33 = vrot.slane %v335_v20, %v343_v21 }
 0x110   :  { %2071 = vmatpush1.bf16.msra.mxu1 %v3159_v62 }
 0x111   :  { %2243 = vmatpush1.bf16.msra.mxu0 %v3162_v63  ;;  %2072 = vmatprep.subr.bf16.mxu1 %v3167_v0 }
 0x112   :  { %2244 = vmatprep.subr.bf16.mxu0 %v3170_v1 }
 0x114   :  { %2073 = vmatpush1.bf16.msra.mxu1 %v3165_v2 }
 0x115   :  { %2245 = vmatpush1.bf16.msra.mxu0 %v3168_v3  ;;  %2074 = vmatprep.subr.bf16.mxu1 %v3173_v4 }
 0x116   :  { %2246 = vmatprep.subr.bf16.mxu0 %v3176_v5 }
 0x118   :  { %2075 = vmatpush1.bf16.msra.mxu1 %v3171_v6 }
 0x119   :  { %2247 = vmatpush1.bf16.msra.mxu0 %v3174_v7  ;;  %2076 = vmatprep.subr.bf16.mxu1 %v3179_v8 }
 0x11a   :  { %2248 = vmatprep.subr.bf16.mxu0 %v3182_v9 }
 0x11c   :  { %2077 = vmatpush1.bf16.msra.mxu1 %v3177_v10 }
 0x11d   :  { %2249 = vmatpush1.bf16.msra.mxu0 %v3180_v11  ;;  %2078 = vmatprep.subr.bf16.mxu1 %v3185_v12 }
 0x11e   :  { %2250 = vmatprep.subr.bf16.mxu0 %v3188_v13 }
 0x120   :  { %2079 = vmatpush1.bf16.msra.mxu1 %v3183_v14 }
 0x121   :  { %2251 = vmatpush1.bf16.msra.mxu0 %v3186_v15  ;;  %2080 = vmatprep.subr.bf16.mxu1 %v3191_v16 }
 0x122   :  { %2252 = vmatprep.subr.bf16.mxu0 %v3194_v17 }
 0x124   :  { %2081 = vmatpush1.bf16.msra.mxu1 %v3189_v26 }
 0x125   :  { %2253 = vmatpush1.bf16.msra.mxu0 %v3192_v27  ;;  %2082 = vmatprep.subr.bf16.mxu1 %v3197_v30  ;;  %v2733_v30 = vld [vmem:[%s3545_s4] ss:$0 sm:$0xff] }
 0x126   :  { %2254 = vmatprep.subr.bf16.mxu0 %v3200_v35 }
 0x128   :  { %2083 = vmatpush1.bf16.msra.mxu1 %v3195_v54 }
 0x129   :  { %2255 = vmatpush1.bf16.msra.mxu0 %v3198_v38  ;;  %2084 = vmatprep.subr.bf16.mxu1 %v3203_v40 }
 0x12a   :  { %2256 = vmatprep.subr.bf16.mxu0 %v3206_v41 }
 0x12c   :  { %2085 = vmatpush1.bf16.msra.mxu1 %v3201_v42 }
 0x12d   :  { %2257 = vmatpush1.bf16.msra.mxu0 %v3204_v44  ;;  %2086 = vmatprep.subr.bf16.mxu1 %v3209_v45 }
 0x12e   :  { %2258 = vmatprep.subr.bf16.mxu0 %v3212_v46 }
 0x130   :  { %2087 = vmatpush1.bf16.msra.mxu1 %v3207_v24 }
 0x131   :  { %2259 = vmatpush1.bf16.msra.mxu0 %v3210_v25  ;;  %2088 = vmatprep.subr.bf16.mxu1 %v3215_v31 }
 0x132   :  { %2260 = vmatprep.subr.bf16.mxu0 %v3218_v36 }
 0x134   :  { %2089 = vmatpush1.bf16.msra.mxu1 %v3213_v39 }
 0x135   :  { %2261 = vmatpush1.bf16.msra.mxu0 %v3216_v43  ;;  %2090 = vmatprep.subr.bf16.mxu1 %v3221_v48 }
 0x136   :  { %2262 = vmatprep.subr.bf16.mxu0 %v3224_v49 }
 0x138   :  { %2091 = vmatpush1.bf16.msra.mxu1 %v3219_v50 }
 0x139   :  { %2263 = vmatpush1.bf16.msra.mxu0 %v3222_v51  ;;  %2750 = vmatprep.subr.bf16.mxu1 %v3225_v52 }
 0x13b   :  { %2093 = vmatmul.mubr.bf16.vlgmr.msra.gmra.mrb[0].mxu1 %v494_v34  ;;  %v3239_v34 = vld [vmem:[#allocation7 + $0x78] sm:$0xff]  }
 0x13c   :  { %2265 = vmatmul.mubr.bf16.vlgmr.msra.gmra.mrb[0].mxu0 %v630_v37  ;;  %2751 = vmatpush3.bf16.msra.mxu1 %v3226_v53  ;;  %v3240_v37 = vld [vmem:[#allocation7 + $0x38] sm:$0xff]  }
 0x13d   :  { %2752 = vmatprep.subr.bf16.mxu1 %v3227_v55 }
 0x140   :  { %2753 = vmatpush3.bf16.msra.mxu1 %v3228_v56 }
 0x141   :  { %2754 = vmatprep.subr.bf16.mxu1 %v3229_v57 }
 0x144   :  { %2755 = vmatpush3.bf16.msra.mxu1 %v3230_v58 }
 0x145   :  { %2756 = vmatprep.subr.bf16.mxu1 %v3231_v59 }
 0x148   :  { %2757 = vmatpush3.bf16.msra.mxu1 %v3232_v60 }
 0x149   :  { %2758 = vmatprep.subr.bf16.mxu1 %v3233_v61 }
 0x14c   :  { %2759 = vmatpush3.bf16.msra.mxu1 %v3234_v18 }
 0x14d   :  { %2760 = vmatprep.subr.bf16.mxu1 %v3235_v22 }
 0x150   :  { %2761 = vmatpush3.bf16.msra.mxu1 %v3236_v23 }
 0x151   :  { %2762 = vmatprep.subr.bf16.mxu1 %v3237_v28 }
 0x154   :  { %2763 = vmatpush3.bf16.msra.mxu1 %v3238_v29 }
 0x155   :  { %2764 = vmatprep.subr.bf16.mxu1 %v3239_v34 }
 0x158   :  { %2765 = vmatpush3.bf16.msra.mxu1 %v3240_v37 }
 0x20e   :  { %v2094_v62 = vpop.f32.mrb[0].mxu1 }
 0x20f   :  { %v2266_v63 = vpop.f32.mrb[0].mxu0  ;;  %v2772_v0 = vadd.f32 %v2094_v62, %v340_v32  ;;  %v2096_v1 = vpop.f32.mrb[1].mxu1 }
 0x210   :  { %v2268_v2 = vpop.f32.mrb[1].mxu0  ;;  %v2774_v3 = vadd.f32 %v2096_v1, %v344_v33  ;;  %v2098_v4 = vpop.f32.mrb[2].mxu1 }
 0x211   :  { %v2270_v5 = vpop.f32.mrb[2].mxu0  ;;  %v2773_v6 = vadd.f32 %v2772_v0, %v2266_v63  ;;  %v2776_v7 = vadd.f32 %v2098_v4, %v340_v32  ;;  %v2100_v8 = vpop.f32.mrb[3].mxu1 }
 0x212   :  { %v2272_v9 = vpop.f32.mrb[3].mxu0  ;;  %v2775_v10 = vadd.f32 %v2774_v3, %v2268_v2  ;;  %v2778_v11 = vadd.f32 %v2100_v8, %v344_v33 }
 0x213   :  { %v2777_v12 = vadd.f32 %v2776_v7, %v2270_v5  ;;  %v2275_v14 = vmax.f32 %v2773_v6, 0.0 }
 0x214   :  { %v2779_v13 = vadd.f32 %v2778_v11, %v2272_v9  ;;  %v2276_v15 = vmax.f32 %v2775_v10, 0.0 }
 0x215   :  { %v2277_v47 = vmax.f32 %v2777_v12, 0.0 }
 0x216   :  { %v2278_v16 = vmax.f32 %v2779_v13, 0.0 }
 0x217   :  { %v2279_v17 = vpack.c.bf16 %v2277_v47, %v2275_v14 }
 0x218   :  { %v2280_v26 = vpack.c.bf16 %v2278_v16, %v2276_v15 }
 0x21a   :  { %2448 = vmatprep.mubr.bf16.mxu1 %v2280_v26 }
 0x21b   :  { %2449 = vmatmul.mubr.bf16.vlgmr.msra.gmra.mrb[4].mxu1 %v2279_v17 }
 0x2ee   :  { %v2766_v27 = vpop.f32.mrb[4].mxu1 }
 0x2ef   :  { %v2767_v35 = vpop.f32.mrb[5].mxu1 }
 0x2f0   :  { %v2768_v54 = vadd.f32 %v2767_v35, %v2766_v27  ;;  %v2769_v38 = vpop.f32.mrb[6].mxu1 }
 0x2f1   :  { %v2770_v40 = vpop.f32.mrb[7].mxu1 }
 0x2f2   :  { %v2451_v41 = vadd.f32 %v2768_v54, %v2733_v30  ;;  %v2771_v42 = vadd.f32 %v2770_v40, %v2769_v38 }
 0x2f4   :  { %2457 = vst [vmem:[#allocation8] sm:$0xff] %v2451_v41  ;;  %v2454_v44 = vadd.f32 %v2771_v42, %v2733_v30 }
 0x2f6   :  { %2458 = vst [vmem:[#allocation8 + $0x8] sm:$0xff] %v2454_v44 }
 0x2f7   :  { %2463 = vsyncadd [#allocation4], 224  ;;  %s3345_s11 = smov [#allocation8]  }
 0x2f8   :  { %s2464_s12 = sshll.u32 %s3345_s11, 4  ;;  %s2465_s12 = int_to_ptr.vmem [resolvable:$true] %s2464_s12 }
 0x2f9   :  { %s3307_s13 = scalar_lea.vmem %s2465_s12, 32  ;;  %s3311_s14 = scalar_lea.vmem %s2465_s12, 256 }
 0x2fa   :  { %p3308_p10 = scmp.ne.s32.totalorder %s2465_s12, %s3307_s13  ;;  %p3312_p11 = scmp.lt.s32.totalorder %s2465_s12, %s2465_s12 }
 0x2fb   :  { %p3313_p12 = scmp.lt.s32.totalorder %s3311_s14, %s3307_s13 }
 0x2fd   :  { %p3314_p13 = por %p3313_p12, %p3312_p11 }
 0x2ff   :  { %p3315_p0 = pnand %p3314_p13, %p3308_p10 }
 0x301   :  { %3318 = shalt.err (!%p3315_p0)
}
 0x302   :  { %s3319_s16 = scalar_lea.hbm %s3546_s5, 32 }
 0x303   :  { %p3320_p1 = scmp.ne.s32.totalorder %s3546_s5, %s3319_s16  ;;  %p3323_p2 = scmp.lt.u32.totalorder %s3319_s16, %s3546_s5 }
 0x305   :  { %p3325_p3 = pnand %p3323_p2, %p3320_p1 }
 0x307   :  { %3328 = shalt.err (!%p3325_p3)
}
 0x308   :  { %s3346_s20 = smov 32   ;;  %s3347_s21 = smov 2  }
 0x309   :  { %2470 = dma.vmem_to_hbm [thread:$0]  %s2465_s12, 32, %s3546_s5, [#allocation4], %s3346_s20, %s3346_s20, %s3347_s21  }
 0x30a   :  { %3333 = dma.done.wait [#allocation4], 256  }
 0x30b   :  { %3334 = vsyncadd [#allocation4], 4294967040 }
 0x30c   :  { %2474 = vsyncpa [#allocation3], 1 }
 0x30d   :  { %2475 = vsyncpa [#allocation6], 1 }
 0x30e   :  { %2476 = vsyncpa [#allocation4], 1 }

</bundles_post_ra>
